<compile_context>
chip_gen: v5e
topology: v5e:2x2
jax: 0.10.0
libtpu: 0.0.40
codegen_flags: <defaults>
</compile_context>

<pallas_src>
import functools

import jax
import jax.numpy as jnp
from jax.experimental import pallas as pl
from jax.experimental.pallas import tpu as pltpu

LRELU_SLOPE = 0.2
IN_EPS = 1e-5


# ---------------------------------------------------------------------------
# helpers
# ---------------------------------------------------------------------------
def _round_up(x, m):
    return (x + m - 1) // m * m


def _pick_div(total, candidates):
    for c in candidates:
        if total % c == 0:
            return c
    return total


def _prep_weight(w_oihw, cin_total, cout_pad):
    """OIHW f32 weight -> [k*k*cin_total, cout_pad] bf16, ordered (kh, kw, c)."""
    cout, cin_w, kh, kw = w_oihw.shape
    w = jnp.transpose(w_oihw, (2, 3, 1, 0))                     # [kh, kw, cin, cout]
    w = jnp.pad(w, ((0, 0), (0, 0),
                    (0, cin_total - cin_w), (0, cout_pad - cout)))
    return w.reshape(kh * kw * cin_total, cout_pad).astype(jnp.bfloat16)


def _im2col_nhwc(x, k, stride, pad):
    """x: [N, H, W, C] -> ([N, Hout*Wout, k*k*C], Hout, Wout); K ordered (kh, kw, c)."""
    N, H, W, C = x.shape
    xp = jnp.pad(x, ((0, 0), (pad, pad), (pad, pad), (0, 0)))
    Hp, Wp = H + 2 * pad, W + 2 * pad
    Hout = (Hp - k) // stride + 1
    Wout = (Wp - k) // stride + 1
    cols = []
    for kh in range(k):
        for kw in range(k):
            cols.append(xp[:, kh:kh + stride * Hout:stride,
                              kw:kw + stride * Wout:stride, :])
    a = jnp.stack(cols, axis=3)                                  # [N, Ho, Wo, k*k, C]
    a = a.reshape(N, Hout * Wout, k * k * C)
    return a, Hout, Wout


# ---------------------------------------------------------------------------
# Pallas kernels
# ---------------------------------------------------------------------------
def _conv_bias_act_kernel(a_ref, b_ref, bias_ref, o_ref, acc_ref, *,
                          apply_lrelu, slope):
    """Tiled A@B with K-axis accumulation; epilogue = +bias (+ LeakyReLU)."""
    k = pl.program_id(1)

    @pl.when(k == 0)
    def _():
        acc_ref[...] = jnp.zeros_like(acc_ref)

    acc_ref[...] += jnp.dot(a_ref[...], b_ref[...],
                            preferred_element_type=jnp.float32)

    @pl.when(k == pl.num_programs(1) - 1)
    def _():
        y = acc_ref[...] + bias_ref[...]
        if apply_lrelu:
            y = jnp.where(y >= 0, y, slope * y)
        o_ref[...] = y.astype(o_ref.dtype)


def _conv_inorm_act_kernel(a_ref, b_ref, o_ref, acc_ref, *, hw, eps, slope):
    """Tiled A@B (no bias) with fused InstanceNorm + LeakyReLU epilogue.

    The M block is one batch element's (padded) H*W rows; padded rows are
    exactly zero (zero im2col rows, no bias), so dividing by the true `hw`
    gives the correct biased mean / variance per output channel.
    """
    k = pl.program_id(1)

    @pl.when(k == 0)
    def _():
        acc_ref[...] = jnp.zeros_like(acc_ref)

    acc_ref[...] += jnp.dot(a_ref[...], b_ref[...],
                            preferred_element_type=jnp.float32)

    @pl.when(k == pl.num_programs(1) - 1)
    def _():
        x = acc_ref[...]                                          # (HWp, Cp) f32
        inv_hw = 1.0 / hw
        mean = jnp.sum(x, axis=0, keepdims=True) * inv_hw
        msq = jnp.sum(x * x, axis=0, keepdims=True) * inv_hw
        var = jnp.maximum(msq - mean * mean, 0.0)
        y = (x - mean) * jax.lax.rsqrt(var + eps)
        o_ref[...] = jnp.where(y >= 0, y, slope * y).astype(o_ref.dtype)


# ---------------------------------------------------------------------------
# conv layer wrappers
# ---------------------------------------------------------------------------
def conv_bias_act(x_nhwc, w_oihw, bias, *, stride, pad, apply_lrelu, out_dtype):
    """Conv2d(bias=True) [+ LeakyReLU]; returns ([N,Ho,Wo,Cout_pad], Cout)."""
    N, H, W, Cin = x_nhwc.shape
    Cout = w_oihw.shape[0]
    k = w_oihw.shape[2]
    cout_pad = _round_up(Cout, 128)

    a, Hout, Wout = _im2col_nhwc(x_nhwc, k, stride, pad)          # [N, hw, K]
    hw = Hout * Wout
    K = a.shape[-1]
    a = a.reshape(N * hw, K)
    M = N * hw
    M_pad = _round_up(M, 8)
    if M_pad != M:
        a = jnp.pad(a, ((0, M_pad - M), (0, 0)))

    tm = _pick_div(M_pad, (256, 128, 64, 32, 16, 8))
    tk = _pick_div(K, (512, 256, 128))

    b = _prep_weight(w_oihw, Cin, cout_pad)
    bias_p = jnp.pad(bias.astype(jnp.float32),
                     (0, cout_pad - Cout)).reshape(1, cout_pad)

    kernel = functools.partial(_conv_bias_act_kernel,
                               apply_lrelu=apply_lrelu, slope=LRELU_SLOPE)
    out = pl.pallas_call(
        kernel,
        out_shape=jax.ShapeDtypeStruct((M_pad, cout_pad), out_dtype),
        grid=(M_pad // tm, K // tk),
        in_specs=[
            pl.BlockSpec((tm, tk), lambda i, kk: (i, kk)),
            pl.BlockSpec((tk, cout_pad), lambda i, kk: (kk, 0)),
            pl.BlockSpec((1, cout_pad), lambda i, kk: (0, 0)),
        ],
        out_specs=pl.BlockSpec((tm, cout_pad), lambda i, kk: (i, 0)),
        scratch_shapes=[pltpu.VMEM((tm, cout_pad), jnp.float32)],
        compiler_params=pltpu.CompilerParams(
            dimension_semantics=("parallel", "arbitrary")),
    )(a.astype(jnp.bfloat16), b, bias_p)

    out = out[:M].reshape(N, Hout, Wout, cout_pad)
    return out, Cout


def conv_inorm_act(x_nhwc, w_oihw, *, stride, pad, out_dtype):
    """Conv2d(bias=False) + InstanceNorm2d + LeakyReLU, fused epilogue."""
    N, H, W, Cin = x_nhwc.shape
    Cout = w_oihw.shape[0]
    k = w_oihw.shape[2]
    cout_pad = _round_up(Cout, 128)

    a, Hout, Wout = _im2col_nhwc(x_nhwc, k, stride, pad)          # [N, hw, K]
    hw = Hout * Wout
    K = a.shape[-1]
    hw_pad = _round_up(hw, 8)
    if hw_pad != hw:
        a = jnp.pad(a, ((0, 0), (0, hw_pad - hw), (0, 0)))

    tk = _pick_div(K, (512, 256, 128))
    b = _prep_weight(w_oihw, Cin, cout_pad)

    kernel = functools.partial(_conv_inorm_act_kernel,
                               hw=float(hw), eps=IN_EPS, slope=LRELU_SLOPE)
    out = pl.pallas_call(
        kernel,
        out_shape=jax.ShapeDtypeStruct((N, hw_pad, cout_pad), out_dtype),
        grid=(N, K // tk),
        in_specs=[
            pl.BlockSpec((None, hw_pad, tk), lambda n, kk: (n, 0, kk)),
            pl.BlockSpec((tk, cout_pad), lambda n, kk: (kk, 0)),
        ],
        out_specs=pl.BlockSpec((None, hw_pad, cout_pad), lambda n, kk: (n, 0, 0)),
        scratch_shapes=[pltpu.VMEM((hw_pad, cout_pad), jnp.float32)],
        compiler_params=pltpu.CompilerParams(
            dimension_semantics=("parallel", "arbitrary")),
    )(a.astype(jnp.bfloat16), b)

    return out[:, :hw, :].reshape(N, Hout, Wout, cout_pad)


# ---------------------------------------------------------------------------
# PatchGAN discriminator forward
# ---------------------------------------------------------------------------
def make_params(key, in_channels, ndf, n_layers):
    """Deterministic synthetic parameters matching the PyTorch module shapes."""
    params = []
    keys = jax.random.split(key, n_layers + 3)

    def w(kk, cout, cin):
        return 0.02 * jax.random.normal(kk, (cout, cin, 4, 4), jnp.float32)

    # first conv (bias=True)
    params.append({"w": w(keys[0], ndf, in_channels),
                   "b": 0.01 * jax.random.normal(keys[1], (ndf,), jnp.float32)})
    nf_mult = 1
    for layer in range(1, n_layers):
        nf_prev, nf_mult = nf_mult, min(2 ** layer, 8)
        params.append({"w": w(keys[1 + layer], ndf * nf_mult, ndf * nf_prev),
                       "b": None})
    nf_prev, nf_mult = nf_mult, min(2 ** n_layers, 8)
    params.append({"w": w(keys[n_layers + 1], ndf * nf_mult, ndf * nf_prev),
                   "b": None})
    # final 1-channel conv (bias=True)
    params.append({"w": w(keys[n_layers + 2], 1, ndf * nf_mult),
                   "b": jnp.zeros((1,), jnp.float32)})
    return params


def patchgan_forward(x_nchw, params, n_layers=3):
    # NCHW -> NHWC (channels-last) once at the boundary; bf16 activations.
    h = jnp.transpose(x_nchw, (0, 2, 3, 1)).astype(jnp.bfloat16)

    # Conv(s=2, bias) + LeakyReLU (fused in matmul epilogue)
    h, _ = conv_bias_act(h, params[0]["w"], params[0]["b"], stride=2, pad=1,
                         apply_lrelu=True, out_dtype=jnp.bfloat16)
    # intermediate: Conv(s=2, no bias) + InstanceNorm + LeakyReLU (fully fused)
    for layer in range(1, n_layers):
        h = conv_inorm_act(h, params[layer]["w"], stride=2, pad=1,
                           out_dtype=jnp.bfloat16)
    # Conv(s=1, no bias) + InstanceNorm + LeakyReLU (fully fused)
    h = conv_inorm_act(h, params[n_layers]["w"], stride=1, pad=1,
                       out_dtype=jnp.bfloat16)
    # final Conv(s=1, bias) -> 1 channel (lane-padded, sliced afterwards)
    out, cout = conv_bias_act(h, params[n_layers + 1]["w"],
                              params[n_layers + 1]["b"], stride=1, pad=1,
                              apply_lrelu=False, out_dtype=jnp.float32)
    out = out[..., :cout]                               # drop channel padding
    return jnp.transpose(out, (0, 3, 1, 2))             # back to NCHW


# ---------------------------------------------------------------------------
if __name__ == "__main__":
    # Small shapes consistent with the module:
    #   in_channels=4, ndf=16, n_layers=3, input [2, 4, 32, 32]
    #   spatial 32 -> 16 -> 8 -> 4 -> 3 -> 2 ; output [2, 1, 2, 2]
    in_channels, ndf, n_layers = 4, 16, 3
    key = jax.random.PRNGKey(0)
    kx, kp = jax.random.split(key)
    x = jax.random.normal(kx, (2, in_channels, 32, 32), jnp.float32)
    params = make_params(kp, in_channels, ndf, n_layers)

    out = patchgan_forward(x, params, n_layers=n_layers)
    out = jax.block_until_ready(out)
    assert out.shape == (2, 1, 2, 2), out.shape
    assert bool(jnp.all(jnp.isfinite(out)))
    print("KERNEL_OK")
</pallas_src>

<mosaic_0001>
module attributes {stable_mosaic.version = 11 : i64} {
  func.func @_conv_bias_act_kernel(%arg0: i32, %arg1: i32, %arg2: memref<256x64xbf16, #tpu.memory_space<vmem>>, %arg3: memref<64x128xbf16, #tpu.memory_space<vmem>>, %arg4: memref<1x128xf32, #tpu.memory_space<vmem>>, %arg5: memref<256x128xbf16, #tpu.memory_space<vmem>>, %arg6: memref<256x128xf32, #tpu.memory_space<vmem>>) attributes {dimension_semantics = [#tpu.dimension_semantics<parallel>, #tpu.dimension_semantics<arbitrary>], iteration_bounds = array<i64: 2, 1>, scalar_prefetch = 0 : i64, scratch_operands = 1 : i64, tpu.core_type = #tpu.core_type<tc>, window_params = [{transform_indices = @transform_0, window_bounds = array<i64: 256, 64>}, {transform_indices = @transform_1, window_bounds = array<i64: 64, 128>}, {pipeline_mode = #tpu.pipeline_mode<synchronous>, transform_indices = @transform_2, window_bounds = array<i64: 1, 128>}, {transform_indices = @transform_3, window_bounds = array<i64: 256, 128>}]} {
    %c0_i32 = arith.constant 0 : i32
    %0 = arith.cmpi eq, %arg1, %c0_i32 : i32
    %1 = arith.extui %0 : i1 to i32
    %c0_i32_0 = arith.constant 0 : i32
    %2 = arith.cmpi ne, %1, %c0_i32_0 : i32
    scf.if %2 {
      %cst_10 = arith.constant 0.000000e+00 : f32
      %12 = vector.broadcast %cst_10 : f32 to vector<256x128xf32>
      %c0_11 = arith.constant 0 : index
      %c0_12 = arith.constant 0 : index
      %13 = vector.load %arg6[%c0_11, %c0_12] : memref<256x128xf32, #tpu.memory_space<vmem>>, vector<256x128xf32>
      tpu.vector_store %arg6[%c0_11, %c0_12], %12 {strides = array<i32>} : memref<256x128xf32, #tpu.memory_space<vmem>>, vector<256x128xf32>,
    } else {
    }
    %c0 = arith.constant 0 : index
    %c0_1 = arith.constant 0 : index
    %3 = vector.load %arg6[%c0, %c0_1] : memref<256x128xf32, #tpu.memory_space<vmem>>, vector<256x128xf32>
    %c0_2 = arith.constant 0 : index
    %c0_3 = arith.constant 0 : index
    %4 = vector.load %arg2[%c0_2, %c0_3] : memref<256x64xbf16, #tpu.memory_space<vmem>>, vector<256x64xbf16>
    %c0_4 = arith.constant 0 : index
    %c0_5 = arith.constant 0 : index
    %5 = vector.load %arg3[%c0_4, %c0_5] : memref<64x128xbf16, #tpu.memory_space<vmem>>, vector<64x128xbf16>
    %cst = arith.constant dense<0.000000e+00> : vector<256x128xf32>
    %6 = tpu.matmul %4, %5, %cst {dimension_numbers = #tpu.dot_dimension_numbers<[1], [0], [0], [1], [0, 0, 1, 1], [], []>} : vector<256x64xbf16>, vector<64x128xbf16>, vector<256x128xf32> -> vector<256x128xf32>
    %7 = arith.addf %3, %6 : vector<256x128xf32>
    %c0_6 = arith.constant 0 : index
    %c0_7 = arith.constant 0 : index
    %8 = vector.load %arg6[%c0_6, %c0_7] : memref<256x128xf32, #tpu.memory_space<vmem>>, vector<256x128xf32>
    tpu.vector_store %arg6[%c0_6, %c0_7], %7 {strides = array<i32>} : memref<256x128xf32, #tpu.memory_space<vmem>>, vector<256x128xf32>,
    %c0_i32_8 = arith.constant 0 : i32
    %9 = arith.cmpi eq, %arg1, %c0_i32_8 : i32
    %10 = arith.extui %9 : i1 to i32
    %c0_i32_9 = arith.constant 0 : i32
    %11 = arith.cmpi ne, %10, %c0_i32_9 : i32
    scf.if %11 {
      %c0_10 = arith.constant 0 : index
      %c0_11 = arith.constant 0 : index
      %12 = vector.load %arg6[%c0_10, %c0_11] : memref<256x128xf32, #tpu.memory_space<vmem>>, vector<256x128xf32>
      %c0_12 = arith.constant 0 : index
      %c0_13 = arith.constant 0 : index
      %13 = vector.load %arg4[%c0_12, %c0_13] : memref<1x128xf32, #tpu.memory_space<vmem>>, vector<1x128xf32>
      %14 = vector.broadcast %13 : vector<1x128xf32> to vector<256x128xf32>
      %15 = arith.addf %12, %14 : vector<256x128xf32>
      %cst_14 = arith.constant 0.000000e+00 : f32
      %16 = vector.broadcast %cst_14 : f32 to vector<256x128xf32>
      %17 = arith.cmpf oge, %15, %16 : vector<256x128xf32>
      %cst_15 = arith.constant 2.000000e-01 : f32
      %18 = vector.broadcast %cst_15 : f32 to vector<256x128xf32>
      %19 = arith.mulf %18, %15 : vector<256x128xf32>
      %20 = arith.select %17, %15, %19 : vector<256x128xi1>, vector<256x128xf32>
      %21 = arith.truncf %20 : vector<256x128xf32> to vector<256x128xbf16>
      %c0_16 = arith.constant 0 : index
      %c0_17 = arith.constant 0 : index
      %22 = vector.load %arg5[%c0_16, %c0_17] : memref<256x128xbf16, #tpu.memory_space<vmem>>, vector<256x128xbf16>
      tpu.vector_store %arg5[%c0_16, %c0_17], %21 {strides = array<i32>} : memref<256x128xbf16, #tpu.memory_space<vmem>>, vector<256x128xbf16>,
    } else {
    }
    return
  }
  func.func @transform_0(%arg0: i32, %arg1: i32) -> (i32, i32) {
    %c0_i32 = arith.constant 0 : i32
    return %arg0, %arg1 : i32, i32
  }
  func.func @transform_1(%arg0: i32, %arg1: i32) -> (i32, i32) {
    %c0_i32 = arith.constant 0 : i32
    %c0_i32_0 = arith.constant 0 : i32
    return %arg1, %c0_i32 : i32, i32
  }
  func.func @transform_2(%arg0: i32, %arg1: i32) -> (i32, i32) {
    %c0_i32 = arith.constant 0 : i32
    %c0_i32_0 = arith.constant 0 : i32
    %c0_i32_1 = arith.constant 0 : i32
    return %c0_i32, %c0_i32_0 : i32, i32
  }
  func.func @transform_3(%arg0: i32, %arg1: i32) -> (i32, i32) {
    %c0_i32 = arith.constant 0 : i32
    %c0_i32_0 = arith.constant 0 : i32
    return %arg0, %c0_i32 : i32, i32
  }
}

</mosaic_0001>

<bundles_post_ra>
// kernel: tpu_custom_call.1
= control target key start
LH: loop header
LB: loop body
LE: loop exit
PB: predicated region body
PF: predicated region fallthrough
CT: control target
= control target key end

     0   :  { %8 = vsyncpa [#allocation4], 0  ;;  %s1567_s0 = inlined_call_operand.vmem [shape: bf16[512,64], index: 0, kind: input, shape index: {}]   ;;  %s1568_s1 = inlined_call_operand.vmem [shape: bf16[64,128], index: 1, kind: input, shape index: {}]   ;;  %s1569_s2 = inlined_call_operand.vmem [shape: f32[1,128], index: 2, kind: input, shape index: {}]   ;;  %s1570_s3 = inlined_call_operand.hbm [shape: bf16[512,128], index: 3, kind: output, shape index: {}]  }
   0x1   :  { %10 = vsyncpa [#allocation4 + $0x1], 0  ;;  %s1365_s12 = smov 0   ;;  %s1367_s13 = smov 0  }
   0x2   :  { %s1369_s14 = smov 0   ;;  %s1371_s15 = smov 0  }
   0x3   :  { %s1373_s16 = smov 0   ;;  %s1375_s17 = smov 0  }
   0x4 LB: > { %s967_s18 = sadd.s32 4294967295, %s1341_s17   ;;  %s968_s19 = sadd.s32 4294967294, %s1341_s17   ;;  %s1341_s17 = sphi %s1375_s17, %s16_s17   ;;  %s1337_s16 = sphi %s1373_s16, %s1577_s16   ;;  %s1333_s15 = sphi %s1371_s15, %s1576_s15   ;;  %s1329_s14 = sphi %s1369_s14, %s1575_s14   ;;  %s1325_s13 = sphi %s1367_s13, %s1574_s13   ;;  %s1321_s12 = sphi %s1365_s12, %s1573_s12  }
   0x5   : > { %s28_s20 = sadd.s32 1, %s1337_s16  ;;  %s110_s21 = sadd.s32 1, %s1329_s14 }
   0x6   : > { %p30_p0 = scmp.ge.s32.totalorder %s28_s20, 2  ;;  %p120_p1 = scmp.ne.s32.totalorder %s1329_s14, %s1325_s13 }
   0x7   : > { %p121_p2 = scmp.eq.s32.totalorder %s967_s18, 1  ;;  %p126_p3 = scmp.ne.s32.totalorder %s1325_s13, %s1321_s12 }
   0x8   : > { %s1579_s20 = smov (%p30_p0, %s28_s20), 0  ;;  %p127_p5 = scmp.eq.s32.totalorder %s968_s19, 1 }
   0x9   : > { %p1405_p4 = por %p121_p2, %p120_p1  ;;  %s107_s23 = ssub.s32 %s1337_s16, %s1579_s20 }
   0xa   : > { %p972_p6 = scmp.ge.s32.totalorder %s1341_s17, 1  ;;  %p108_p7 = scmp.eq.s32.totalorder %s107_s23, 0 }
   0xb   : > { %p1412_p8 = por %p127_p5, %p126_p3  ;;  %p169_p9 = scmp.lt.s32.totalorder %s1341_s17, 3 }
   0xc   : > { %s1418_s25 = scalar_select %p108_p7, %s1329_s14, %s110_s21  }
   0xd   : > { %p170_p10 = pnand %p972_p6, %p169_p9 }
   0xe   : > { %s974_s28 = sshll.u32 (!%p170_p10), %s1333_s15, 5  ;;  %s198_s21 = sand.u32 (!%p170_p10), 1, %s1325_s13  }
   0xf   : > { %173 = sbr.rel (%p170_p10) target bundleno = 237 (0xed), region = 32  ;;  %p202_p11 = scmp.lt.s32.totalorder (!%p170_p10), %s974_s28, 63 }
  0x10   : > { %s973_s23 = sshll.u32 (!%p170_p10), %s198_s21, 7  ;;  %s1097_s27 = sshll.u32 (!%p170_p10), %s1333_s15, 7 }
  0x11   : > { %s1484_s26 = scalar_lea.vmem (!%p170_p10), [#allocation3], %s973_s23  ;;  %s875_s15 = scalar_lea.hbm (!%p170_p10), %s1570_s3, %s1097_s27 }
  0x12   : > { %s876_s30 = sshll.u32 (!%p170_p10), %s1484_s26, 4  ;;  %s878_s4 = sshll.u32 (!%p170_p10), %s875_s15, 4  ;;  %s877_s30 = int_to_ptr.vmem [resolvable:$true] %s876_s30  ;;  %s879_s4 = int_to_ptr.hbm [resolvable:$true] %s878_s4 }
  0x13   : > { %s864_s5 = scalar_lea.sflag (!%p170_p10), [#allocation4], %s198_s21  ;;  %s1283_s10 = scalar_lea.hbm (!%p170_p10), %s1570_s3, 256 }
  0x14   : > { %v1096_v0 = vld [vmem:[%s1568_s1 + $0x18] sm:$0xff]  ;;  %v1095_v1 = vld [vmem:[%s1568_s1 + $0x10] sm:$0xff]  ;;  %s1581_s28 = smov (!%p202_p11, %s974_s28), 63  ;;  %v1094_v2 = vld [vmem:[%s1568_s1 + $0x8] sm:$0xff]  ;;  %vm430_vm0 = vcmask 523264  }
  0x15   : > { %483 = vmatpush.bf16.msra.mxu0 %v1096_v0  ;;  %1193 = vmatpush.bf16.msra.mxu1 %v1096_v0  ;;  %s975_s6 = sshll.u32 %s1581_s28, 2  ;;  %v1093_v3 = vld [vmem:[%s1568_s1] sm:$0xff] }
  0x16   : > { %1194 = vmatpush.bf16.msra.mxu2 %v1096_v0  ;;  %1195 = vmatpush.bf16.msra.mxu3 %v1096_v0  ;;  %s1436_s11 = scalar_lea.vmem %s1567_s0, %s975_s6  ;;  %v1473_v22 = vld [vmem:[%s1569_s2] ss:$0 sm:$0xff]  ;;  %s1277_s6 = sshra.s32 %s879_s4, 4  ;;  %s1278_s6 = int_to_ptr.hbm [resolvable:$true] %s1277_s6 }
  0x17   : > { %v1077_v4 = vld [vmem:[%s1436_s11] sm:$0xff]  ;;  %v1078_v8 = vld [vmem:[%s1436_s11 + $0x8] sm:$0xff]  ;;  %v1079_v12 = vld [vmem:[%s1436_s11 + $0x10] sm:$0xff]  ;;  %s1279_s7 = scalar_lea.hbm %s1278_s6, 128  ;;  %p1284_p1 = scmp.lt.s32.totalorder %s1278_s6, %s1570_s3 }
  0x18   : > { %v1081_v5 = vld [vmem:[%s1436_s11 + $0x20] sm:$0xff]  ;;  %v1082_v9 = vld [vmem:[%s1436_s11 + $0x28] sm:$0xff]  ;;  %v1083_v13 = vld [vmem:[%s1436_s11 + $0x30] sm:$0xff]  ;;  %p1280_p12 = scmp.ne.s32.totalorder %s1278_s6, %s1279_s7  ;;  %p1285_p2 = scmp.lt.s32.totalorder %s1283_s10, %s1279_s7 }
  0x19   : > { %484 = vmatpush.bf16.msra.mxu0 %v1095_v1  ;;  %1196 = vmatpush.bf16.msra.mxu1 %v1095_v1  ;;  %v1085_v6 = vld [vmem:[%s1436_s11 + $0x40] sm:$0xff]  ;;  %v1086_v10 = vld [vmem:[%s1436_s11 + $0x48] sm:$0xff]  ;;  %v1087_v14 = vld [vmem:[%s1436_s11 + $0x50] sm:$0xff] }
  0x1a   : > { %1197 = vmatpush.bf16.msra.mxu2 %v1095_v1  ;;  %1198 = vmatpush.bf16.msra.mxu3 %v1095_v1  ;;  %v1089_v7 = vld [vmem:[%s1436_s11 + $0x60] sm:$0xff]  ;;  %v1090_v11 = vld [vmem:[%s1436_s11 + $0x68] sm:$0xff]  ;;  %v1091_v15 = vld [vmem:[%s1436_s11 + $0x70] sm:$0xff]  ;;  %p1281_p13 = pnand %p1280_p12, %p1405_p4  ;;  %p1286_p3 = por %p1285_p2, %p1284_p1 }
  0x1b   : > { %v1080_v16 = vld [vmem:[%s1436_s11 + $0x18] sm:$0xff] }
  0x1c   : > { %v1084_v17 = vld [vmem:[%s1436_s11 + $0x38] sm:$0xff]  ;;  %p1282_p0 = pneg %p1281_p13 }
  0x1d   : > { %485 = vmatpush.bf16.msra.mxu0 %v1094_v2  ;;  %1199 = vmatpush.bf16.msra.mxu1 %v1094_v2  ;;  %v1088_v18 = vld [vmem:[%s1436_s11 + $0x58] sm:$0xff] }
  0x1e   : > { %1200 = vmatpush.bf16.msra.mxu2 %v1094_v2  ;;  %1201 = vmatpush.bf16.msra.mxu3 %v1094_v2  ;;  %v1092_v19 = vld [vmem:[%s1436_s11 + $0x78] sm:$0xff]  ;;  %p1287_p5 = pnand %p1286_p3, %p1282_p0 }
  0x21   : > { %486 = vmatpush.bf16.msra.mxu0 %v1093_v3  ;;  %1202 = vmatpush.bf16.msra.mxu1 %v1093_v3 }
  0x22   : > { %1203 = vmatpush.bf16.msra.mxu2 %v1093_v3  ;;  %1204 = vmatpush.bf16.msra.mxu3 %v1093_v3 }
  0x24   : > { %1056 = vmatmul.msk.bf16.vlgmr.msra.gmra.mxu0 %vm430_vm0, %v1077_v4  ;;  %1060 = vmatmul.msk.bf16.vlgmr.msra.gmra.mxu1 %vm430_vm0, %v1081_v5 }
  0x25   : > { %1064 = vmatmul.msk.bf16.vlgmr.msra.gmra.mxu2 %vm430_vm0, %v1085_v6  ;;  %1068 = vmatmul.msk.bf16.vlgmr.msra.gmra.mxu3 %vm430_vm0, %v1089_v7 }
  0x34   : > { %1057 = vmatmul.msk.bf16.gmra.mxu0 %vm430_vm0, %v1078_v8  ;;  %1061 = vmatmul.msk.bf16.gmra.mxu1 %vm430_vm0, %v1082_v9 }
  0x35   : > { %1065 = vmatmul.msk.bf16.gmra.mxu2 %vm430_vm0, %v1086_v10  ;;  %1069 = vmatmul.msk.bf16.gmra.mxu3 %vm430_vm0, %v1090_v11 }
  0x44   : > { %1058 = vmatmul.msk.bf16.gmra.mxu0 %vm430_vm0, %v1079_v12  ;;  %1062 = vmatmul.msk.bf16.gmra.mxu1 %vm430_vm0, %v1083_v13 }
  0x45   : > { %1066 = vmatmul.msk.bf16.gmra.mxu2 %vm430_vm0, %v1087_v14  ;;  %1070 = vmatmul.msk.bf16.gmra.mxu3 %vm430_vm0, %v1091_v15 }
  0x54   : > { %1059 = vmatmul.msk.bf16.gmra.mxu0 %vm430_vm0, %v1080_v16  ;;  %1063 = vmatmul.msk.bf16.gmra.mxu1 %vm430_vm0, %v1084_v17 }
  0x55   : > { %1067 = vmatmul.msk.bf16.gmra.mxu2 %vm430_vm0, %v1088_v18  ;;  %1071 = vmatmul.msk.bf16.gmra.mxu3 %vm430_vm0, %v1092_v19 }
  0xa1   : > { %v488_v20 = vpop.f32.mrf.mxu0  ;;  %v508_v21 = vpop.f32.mrf.mxu1 }
  0xa2   : > { %v671_v23 = vadd.f32 %v1473_v22, %v488_v20  ;;  %v679_v24 = vadd.f32 %v1473_v22, %v508_v21 }
  0xa4   : > { %v735_v29 = vmul.f32 0.2, %v671_v23  ;;  %v743_v30 = vmul.f32 0.2, %v679_v24  ;;  %vm703_vm1 = vcmp.ge.f32.partialorder %v671_v23, 0.0  ;;  %vm711_vm2 = vcmp.ge.f32.partialorder %v679_v24, 0.0 }
  0xa6   : > { %v767_v37 = vsel %vm703_vm1, %v671_v23, %v735_v29  ;;  %v775_v38 = vsel %vm711_vm2, %v679_v24, %v743_v30 }
  0xa8   : > { %v528_v25 = vpop.f32.mrf.mxu2  ;;  %v548_v26 = vpop.f32.mrf.mxu3 }
  0xa9   : > { %v490_v27 = vpop.f32.mrf.mxu0  ;;  %v510_v28 = vpop.f32.mrf.mxu1  ;;  %v687_v35 = vadd.f32 %v1473_v22, %v528_v25  ;;  %v695_v36 = vadd.f32 %v1473_v22, %v548_v26 }
  0xaa   : > { %v672_v31 = vadd.f32 %v1473_v22, %v490_v27  ;;  %v680_v32 = vadd.f32 %v1473_v22, %v510_v28 }
  0xab   : > { %v751_v45 = vmul.f32 0.2, %v687_v35  ;;  %v759_v46 = vmul.f32 0.2, %v695_v36  ;;  %vm719_vm5 = vcmp.ge.f32.partialorder %v687_v35, 0.0  ;;  %vm727_vm6 = vcmp.ge.f32.partialorder %v695_v36, 0.0 }
  0xac   : > { %vm704_vm3 = vcmp.ge.f32.partialorder %v672_v31, 0.0  ;;  %v736_v33 = vmul.f32 0.2, %v672_v31  ;;  %vm712_vm4 = vcmp.ge.f32.partialorder %v680_v32, 0.0  ;;  %v744_v34 = vmul.f32 0.2, %v680_v32 }
  0xad   : > { %v783_v53 = vsel %vm719_vm5, %v687_v35, %v751_v45  ;;  %v791_v54 = vsel %vm727_vm6, %v695_v36, %v759_v46 }
  0xae   : > { %v768_v39 = vsel %vm704_vm3, %v672_v31, %v736_v33  ;;  %v776_v40 = vsel %vm712_vm4, %v680_v32, %v744_v34 }
  0xaf   : > { %v1101_v41 = vpack.c.bf16 %v768_v39, %v767_v37  ;;  %v1121_v42 = vpack.c.bf16 %v776_v40, %v775_v38 }
  0xb0   : > { %v530_v43 = vpop.f32.mrf.mxu2  ;;  %v550_v44 = vpop.f32.mrf.mxu3 }
  0xb1   : > { %1102 = vst [vmem:[%s1484_s26] sm:$0xff] %v1101_v41   ;;  %v688_v47 = vadd.f32 %v1473_v22, %v530_v43  ;;  %v696_v48 = vadd.f32 %v1473_v22, %v550_v44  ;;  %v493_v49 = vpop.f32.mrf.mxu0  ;;  %v513_v50 = vpop.f32.mrf.mxu1 }
  0xb2   : > { %1181 = vst [vmem:[%s1484_s26 + $0x20] sm:$0xff] %v1121_v42   ;;  %v673_v59 = vadd.f32 %v1473_v22, %v493_v49  ;;  %v681_v60 = vadd.f32 %v1473_v22, %v513_v50 }
  0xb3   : > { %vm720_vm7 = vcmp.ge.f32.partialorder %v688_v47, 0.0  ;;  %v752_v51 = vmul.f32 0.2, %v688_v47  ;;  %vm728_vm8 = vcmp.ge.f32.partialorder %v696_v48, 0.0  ;;  %v760_v52 = vmul.f32 0.2, %v696_v48 }
  0xb4   : > { %v737_v1 = vmul.f32 0.2, %v673_v59  ;;  %v745_v2 = vmul.f32 0.2, %v681_v60  ;;  %vm705_vm9 = vcmp.ge.f32.partialorder %v673_v59, 0.0  ;;  %vm713_vm10 = vcmp.ge.f32.partialorder %v681_v60, 0.0 }
  0xb5   : > { %v784_v55 = vsel %vm720_vm7, %v688_v47, %v752_v51  ;;  %v792_v56 = vsel %vm728_vm8, %v696_v48, %v760_v52 }
  0xb6   : > { %v1141_v57 = vpack.c.bf16 %v784_v55, %v783_v53  ;;  %v1161_v58 = vpack.c.bf16 %v792_v56, %v791_v54  ;;  %v769_v9 = vsel %vm705_vm9, %v673_v59, %v737_v1  ;;  %v777_v10 = vsel %vm713_vm10, %v681_v60, %v745_v2 }
  0xb8   : > { %1185 = vst [vmem:[%s1484_s26 + $0x40] sm:$0xff] %v1141_v57   ;;  %v533_v61 = vpop.f32.mrf.mxu2  ;;  %v553_v62 = vpop.f32.mrf.mxu3 }
  0xb9   : > { %1189 = vst [vmem:[%s1484_s26 + $0x60] sm:$0xff] %v1161_v58   ;;  %v495_v63 = vpop.f32.mrf.mxu0  ;;  %v515_v0 = vpop.f32.mrf.mxu1  ;;  %v689_v7 = vadd.f32 %v1473_v22, %v533_v61  ;;  %v697_v8 = vadd.f32 %v1473_v22, %v553_v62 }
  0xba   : > { %v674_v3 = vadd.f32 %v1473_v22, %v495_v63  ;;  %v682_v4 = vadd.f32 %v1473_v22, %v515_v0 }
  0xbb   : > { %v753_v17 = vmul.f32 0.2, %v689_v7  ;;  %v761_v18 = vmul.f32 0.2, %v697_v8  ;;  %vm721_vm13 = vcmp.ge.f32.partialorder %v689_v7, 0.0  ;;  %vm729_vm14 = vcmp.ge.f32.partialorder %v697_v8, 0.0 }
  0xbc   : > { %vm706_vm11 = vcmp.ge.f32.partialorder %v674_v3, 0.0  ;;  %v738_v5 = vmul.f32 0.2, %v674_v3  ;;  %vm714_vm12 = vcmp.ge.f32.partialorder %v682_v4, 0.0  ;;  %v746_v6 = vmul.f32 0.2, %v682_v4 }
  0xbd   : > { %v785_v26 = vsel %vm721_vm13, %v689_v7, %v753_v17  ;;  %v793_v27 = vsel %vm729_vm14, %v697_v8, %v761_v18 }
  0xbe   : > { %v770_v11 = vsel %vm706_vm11, %v674_v3, %v738_v5  ;;  %v778_v12 = vsel %vm714_vm12, %v682_v4, %v746_v6 }
  0xbf   : > { %v1106_v13 = vpack.c.bf16 %v770_v11, %v769_v9  ;;  %v1126_v14 = vpack.c.bf16 %v778_v12, %v777_v10 }
  0xc0   : > { %v535_v15 = vpop.f32.mrf.mxu2  ;;  %v555_v16 = vpop.f32.mrf.mxu3 }
  0xc1   : > { %1178 = vst [vmem:[%s1484_s26 + $0x8] sm:$0xff] %v1106_v13   ;;  %v690_v19 = vadd.f32 %v1473_v22, %v535_v15  ;;  %v698_v20 = vadd.f32 %v1473_v22, %v555_v16  ;;  %v498_v21 = vpop.f32.mrf.mxu0  ;;  %v518_v23 = vpop.f32.mrf.mxu1 }
  0xc2   : > { %1182 = vst [vmem:[%s1484_s26 + $0x28] sm:$0xff] %v1126_v14   ;;  %v675_v32 = vadd.f32 %v1473_v22, %v498_v21  ;;  %v683_v33 = vadd.f32 %v1473_v22, %v518_v23 }
  0xc3   : > { %vm722_vm15 = vcmp.ge.f32.partialorder %v690_v19, 0.0  ;;  %v754_v24 = vmul.f32 0.2, %v690_v19  ;;  %vm730_vm0 = vcmp.ge.f32.partialorder %v698_v20, 0.0  ;;  %v762_v25 = vmul.f32 0.2, %v698_v20 }
  0xc4   : > { %v739_v38 = vmul.f32 0.2, %v675_v32  ;;  %v747_v39 = vmul.f32 0.2, %v683_v33  ;;  %vm707_vm1 = vcmp.ge.f32.partialorder %v675_v32, 0.0  ;;  %vm715_vm2 = vcmp.ge.f32.partialorder %v683_v33, 0.0 }
  0xc5   : > { %v786_v28 = vsel %vm722_vm15, %v690_v19, %v754_v24  ;;  %v794_v29 = vsel %vm730_vm0, %v698_v20, %v762_v25 }
  0xc6   : > { %v1146_v30 = vpack.c.bf16 %v786_v28, %v785_v26  ;;  %v1166_v31 = vpack.c.bf16 %v794_v29, %v793_v27  ;;  %v771_v46 = vsel %vm707_vm1, %v675_v32, %v739_v38  ;;  %v779_v47 = vsel %vm715_vm2, %v683_v33, %v747_v39 }
  0xc8   : > { %1186 = vst [vmem:[%s1484_s26 + $0x48] sm:$0xff] %v1146_v30   ;;  %v538_v34 = vpop.f32.mrf.mxu2  ;;  %v558_v35 = vpop.f32.mrf.mxu3 }
  0xc9   : > { %1190 = vst [vmem:[%s1484_s26 + $0x68] sm:$0xff] %v1166_v31   ;;  %v500_v36 = vpop.f32.mrf.mxu0  ;;  %v520_v37 = vpop.f32.mrf.mxu1  ;;  %v691_v44 = vadd.f32 %v1473_v22, %v538_v34  ;;  %v699_v45 = vadd.f32 %v1473_v22, %v558_v35 }
  0xca   : > { %v676_v40 = vadd.f32 %v1473_v22, %v500_v36  ;;  %v684_v41 = vadd.f32 %v1473_v22, %v520_v37 }
  0xcb   : > { %v755_v54 = vmul.f32 0.2, %v691_v44  ;;  %v763_v55 = vmul.f32 0.2, %v699_v45  ;;  %vm723_vm5 = vcmp.ge.f32.partialorder %v691_v44, 0.0  ;;  %vm731_vm6 = vcmp.ge.f32.partialorder %v699_v45, 0.0 }
  0xcc   : > { %vm708_vm3 = vcmp.ge.f32.partialorder %v676_v40, 0.0  ;;  %v740_v42 = vmul.f32 0.2, %v676_v40  ;;  %vm716_vm4 = vcmp.ge.f32.partialorder %v684_v41, 0.0  ;;  %v748_v43 = vmul.f32 0.2, %v684_v41 }
  0xcd   : > { %v787_v62 = vsel %vm723_vm5, %v691_v44, %v755_v54  ;;  %v795_v63 = vsel %vm731_vm6, %v699_v45, %v763_v55 }
  0xce   : > { %v772_v48 = vsel %vm708_vm3, %v676_v40, %v740_v42  ;;  %v780_v49 = vsel %vm716_vm4, %v684_v41, %v748_v43 }
  0xcf   : > { %v1111_v50 = vpack.c.bf16 %v772_v48, %v771_v46  ;;  %v1131_v51 = vpack.c.bf16 %v780_v49, %v779_v47 }
  0xd0   : > { %v540_v52 = vpop.f32.mrf.mxu2  ;;  %v560_v53 = vpop.f32.mrf.mxu3 }
  0xd1   : > { %1179 = vst [vmem:[%s1484_s26 + $0x10] sm:$0xff] %v1111_v50   ;;  %v692_v56 = vadd.f32 %v1473_v22, %v540_v52  ;;  %v700_v57 = vadd.f32 %v1473_v22, %v560_v53  ;;  %v503_v58 = vpop.f32.mrf.mxu0  ;;  %v523_v59 = vpop.f32.mrf.mxu1 }
  0xd2   : > { %1183 = vst [vmem:[%s1484_s26 + $0x30] sm:$0xff] %v1131_v51   ;;  %v677_v4 = vadd.f32 %v1473_v22, %v503_v58  ;;  %v685_v5 = vadd.f32 %v1473_v22, %v523_v59 }
  0xd3   : > { %vm724_vm7 = vcmp.ge.f32.partialorder %v692_v56, 0.0  ;;  %v756_v60 = vmul.f32 0.2, %v692_v56  ;;  %vm732_vm8 = vcmp.ge.f32.partialorder %v700_v57, 0.0  ;;  %v764_v61 = vmul.f32 0.2, %v700_v57 }
  0xd4   : > { %v741_v10 = vmul.f32 0.2, %v677_v4  ;;  %v749_v11 = vmul.f32 0.2, %v685_v5  ;;  %vm709_vm9 = vcmp.ge.f32.partialorder %v677_v4, 0.0  ;;  %vm717_vm10 = vcmp.ge.f32.partialorder %v685_v5, 0.0 }
  0xd5   : > { %v788_v0 = vsel %vm724_vm7, %v692_v56, %v756_v60  ;;  %v796_v1 = vsel %vm732_vm8, %v700_v57, %v764_v61 }
  0xd6   : > { %v1151_v2 = vpack.c.bf16 %v788_v0, %v787_v62  ;;  %v1171_v3 = vpack.c.bf16 %v796_v1, %v795_v63  ;;  %v773_v18 = vsel %vm709_vm9, %v677_v4, %v741_v10  ;;  %v781_v19 = vsel %vm717_vm10, %v685_v5, %v749_v11 }
  0xd8   : > { %1187 = vst [vmem:[%s1484_s26 + $0x50] sm:$0xff] %v1151_v2   ;;  %v543_v6 = vpop.f32.mrf.mxu2  ;;  %v563_v7 = vpop.f32.mrf.mxu3 }
  0xd9   : > { %1191 = vst [vmem:[%s1484_s26 + $0x70] sm:$0xff] %v1171_v3   ;;  %v505_v8 = vpop.f32.mrf.mxu0  ;;  %v525_v9 = vpop.f32.mrf.mxu1  ;;  %v693_v16 = vadd.f32 %v1473_v22, %v543_v6  ;;  %v701_v17 = vadd.f32 %v1473_v22, %v563_v7 }
  0xda   : > { %v678_v12 = vadd.f32 %v1473_v22, %v505_v8  ;;  %v686_v13 = vadd.f32 %v1473_v22, %v525_v9 }
  0xdb   : > { %v757_v27 = vmul.f32 0.2, %v693_v16  ;;  %v765_v28 = vmul.f32 0.2, %v701_v17  ;;  %vm725_vm13 = vcmp.ge.f32.partialorder %v693_v16, 0.0  ;;  %vm733_vm14 = vcmp.ge.f32.partialorder %v701_v17, 0.0 }
  0xdc   : > { %vm710_vm11 = vcmp.ge.f32.partialorder %v678_v12, 0.0  ;;  %v742_v14 = vmul.f32 0.2, %v678_v12  ;;  %vm718_vm12 = vcmp.ge.f32.partialorder %v686_v13, 0.0  ;;  %v750_v15 = vmul.f32 0.2, %v686_v13 }
  0xdd   : > { %v789_v33 = vsel %vm725_vm13, %v693_v16, %v757_v27  ;;  %v797_v34 = vsel %vm733_vm14, %v701_v17, %v765_v28 }
  0xde   : > { %v774_v20 = vsel %vm710_vm11, %v678_v12, %v742_v14  ;;  %v782_v21 = vsel %vm718_vm12, %v686_v13, %v750_v15 }
  0xdf   : > { %v1116_v23 = vpack.c.bf16 %v774_v20, %v773_v18  ;;  %v1136_v24 = vpack.c.bf16 %v782_v21, %v781_v19 }
  0xe0   : > { %v545_v25 = vpop.f32.mrf.mxu2  ;;  %v565_v26 = vpop.f32.mrf.mxu3 }
  0xe1   : > { %1180 = vst [vmem:[%s1484_s26 + $0x18] sm:$0xff] %v1116_v23   ;;  %v694_v29 = vadd.f32 %v1473_v22, %v545_v25  ;;  %v702_v30 = vadd.f32 %v1473_v22, %v565_v26 }
  0xe2   : > { %1184 = vst [vmem:[%s1484_s26 + $0x38] sm:$0xff] %v1136_v24  }
  0xe3   : > { %vm726_vm15 = vcmp.ge.f32.partialorder %v694_v29, 0.0  ;;  %v758_v31 = vmul.f32 0.2, %v694_v29  ;;  %vm734_vm0 = vcmp.ge.f32.partialorder %v702_v30, 0.0  ;;  %v766_v32 = vmul.f32 0.2, %v702_v30 }
  0xe5   : > { %v790_v35 = vsel %vm726_vm15, %v694_v29, %v758_v31  ;;  %v798_v36 = vsel %vm734_vm0, %v702_v30, %v766_v32 }
  0xe6   : > { %v1156_v37 = vpack.c.bf16 %v790_v35, %v789_v33  ;;  %v1176_v38 = vpack.c.bf16 %v798_v36, %v797_v34 }
  0xe8   : > { %1188 = vst [vmem:[%s1484_s26 + $0x58] sm:$0xff] %v1156_v37  }
  0xe9   : > { %1192 = vst [vmem:[%s1484_s26 + $0x78] sm:$0xff] %v1176_v38  }
  0xea   : > { %1290 = shalt.err (!%p1287_p5)
}
  0xeb   : > { %s1343_s19 = smov 64   ;;  %s1344_s21 = smov 4  }
  0xec   : > { %1205 = dma.vmem_to_hbm [thread:$0]  (%p1405_p4), %s877_s30, 2048, %s879_s4, %s864_s5, %s1343_s19, %s1343_s19, %s1344_s21  }
  0xed PF: > { %p1211_p6 = scmp.ge.s32.totalorder %s1341_s17, 2  ;;  %s893_s23 = sand.u32 1, %s1321_s12  }
  0xee   : > { %s894_s26 = scalar_lea.sflag [#allocation4], %s893_s23 }
  0xef   : > { %p1208_p7 = pnand %p1211_p6, %p1412_p8 }
  0xf1   : > { %p1209_p9 = pneg %p1208_p7 }
  0xf3   : > { %1316 = dma.done.wait (%p1209_p9), %s894_s26, 2048  }
  0xf4   : > { %1318 = vsyncadd (%p1209_p9), %s894_s26, 4294965248  ;;  %s16_s17 = sadd.s32 1, %s1341_s17   ;;  %s1573_s12 = smov %s1325_s13 }
  0xf5   : > { %p13_p10 = scmp.ge.s32.totalorder %s16_s17, 4   ;;  %s1574_s13 = smov %s1329_s14 }
  0xf6   : > { %s1575_s14 = smov %s1418_s25  ;;  %s1576_s15 = smov %s1337_s16 }
  0xf7   : > { %s1577_s16 = smov %s1579_s20  ;;  %15 = sbr.rel (!%p13_p10) target bundleno = 4 (0x4), region = 78 }
  0xfc   :  { %900 = vsyncpa [#allocation4], 1 }
  0xfd   :  { %902 = vsyncpa [#allocation4 + $0x1], 1 }

</bundles_post_ra>
